<compile_context>
chip_gen: v5e
topology: v5e:2x2
jax: 0.10.0
libtpu: 0.0.40
codegen_flags: <defaults>
</compile_context>

<pallas_src>
import jax
import jax.numpy as jnp
import numpy as np
from jax.experimental import pallas as pl
from jax.experimental.pallas import tpu as pltpu


# ---------------------------------------------------------------------------
# Tiling helper
# ---------------------------------------------------------------------------
def _pick_tile(n, preferred=(512, 256, 128)):
    """MXU-friendly tile that divides n; fall back to the full extent for small N."""
    for t in preferred:
        if n % t == 0:
            return t
    return n  # full-extent block is always a legal BlockSpec shape


# ---------------------------------------------------------------------------
# Pallas kernels
# ---------------------------------------------------------------------------
def _gt_first_kernel(w1_ref, w2_ref, a_ik_ref, a_kj_ref, h_ref, acc_ref):
    """first=True tile.

    Grid: (o, i, j, k).  a_ik_ref: (C_in, tm, tk) block of A at (i, k);
    a_kj_ref: (C_in, tk, tn) block of A at (k, j); h_ref: (1, tm, tn) H[o] tile;
    acc_ref: (tm, tn) f32 accumulator carried over k.
    w1_ref / w2_ref: (C_out, C_in) softmaxed weights resident in SMEM.
    """
    o = pl.program_id(0)
    k = pl.program_id(3)

    @pl.when(k == 0)
    def _init():
        acc_ref[...] = jnp.zeros_like(acc_ref)

    c_in = a_ik_ref.shape[0]
    # Both GTConv channel reductions in ONE unrolled pass, scalar weights from SMEM
    # (no (C_in, tm, tk) broadcast temporary, A block streamed once per operand).
    a = w1_ref[o, 0] * a_ik_ref[0]
    b = w2_ref[o, 0] * a_kj_ref[0]
    for c in range(1, c_in):
        a = a + w1_ref[o, c] * a_ik_ref[c]
        b = b + w2_ref[o, c] * a_kj_ref[c]

    # th.bmm tile: bf16 operands, f32 accumulation on the MXU.
    acc_ref[...] += jnp.dot(a.astype(jnp.bfloat16), b.astype(jnp.bfloat16),
                            preferred_element_type=jnp.float32)

    @pl.when(k == pl.num_programs(3) - 1)
    def _finalize():
        h_ref[0] = acc_ref[...].astype(h_ref.dtype)


def _gt_rest_kernel(w1_ref, hprev_ref, a_kj_ref, h_ref, acc_ref):
    """first=False tile: H[o] = H_prev[o] @ (sum_c sm(W1)[o,c] * A[c])."""
    o = pl.program_id(0)
    k = pl.program_id(3)

    @pl.when(k == 0)
    def _init():
        acc_ref[...] = jnp.zeros_like(acc_ref)

    c_in = a_kj_ref.shape[0]
    a = w1_ref[o, 0] * a_kj_ref[0]
    for c in range(1, c_in):
        a = a + w1_ref[o, c] * a_kj_ref[c]

    acc_ref[...] += jnp.dot(hprev_ref[0].astype(jnp.bfloat16), a.astype(jnp.bfloat16),
                            preferred_element_type=jnp.float32)

    @pl.when(k == pl.num_programs(3) - 1)
    def _finalize():
        h_ref[0] = acc_ref[...].astype(h_ref.dtype)


# ---------------------------------------------------------------------------
# Wrapper (GTLayer.forward)
# ---------------------------------------------------------------------------
def gt_layer_forward(A, conv1_weight, conv2_weight=None, H_prev=None, first=True,
                     tile_m=None, tile_n=None, tile_k=None):
    """A: (C_in, N, N); conv*_weight: (C_out, C_in, 1, 1). Returns (H, W) like PyTorch."""
    A = A.astype(jnp.float32)
    C_in, N, _ = A.shape
    C_out = conv1_weight.shape[0]

    w1_soft = jax.nn.softmax(
        conv1_weight.reshape(C_out, C_in).astype(jnp.float32), axis=1)

    tm = tile_m or _pick_tile(N)
    tn = tile_n or _pick_tile(N)
    tk = tile_k or _pick_tile(N)
    assert N % tm == 0 and N % tn == 0 and N % tk == 0

    grid = (C_out, N // tm, N // tn, N // tk)

    # Tiny (C_out, C_in) weight tables -> SMEM, read as scalars inside the kernel.
    w_spec = pl.BlockSpec(memory_space=pltpu.MemorySpace.SMEM)
    a_ik_spec = pl.BlockSpec((C_in, tm, tk), lambda o, i, j, k: (0, i, k))
    a_kj_spec = pl.BlockSpec((C_in, tk, tn), lambda o, i, j, k: (0, k, j))
    out_spec = pl.BlockSpec((1, tm, tn), lambda o, i, j, k: (o, i, j))
    scratch = [pltpu.VMEM((tm, tn), jnp.float32)]
    cparams = pltpu.CompilerParams(
        dimension_semantics=("parallel", "parallel", "parallel", "arbitrary"))

    if first:
        assert conv2_weight is not None
        w2_soft = jax.nn.softmax(
            conv2_weight.reshape(C_out, C_in).astype(jnp.float32), axis=1)
        cost = pl.CostEstimate(
            flops=2 * C_out * N * N * N + 4 * C_out * C_in * N * N,
            transcendentals=0,
            bytes_accessed=2 * C_in * N * N * 4 + C_out * N * N * 4)
        H = pl.pallas_call(
            _gt_first_kernel,
            out_shape=jax.ShapeDtypeStruct((C_out, N, N), jnp.float32),
            grid=grid,
            in_specs=[w_spec, w_spec, a_ik_spec, a_kj_spec],
            out_specs=out_spec,
            scratch_shapes=scratch,
            compiler_params=cparams,
            cost_estimate=cost,
        )(w1_soft, w2_soft, A, A)
        # W = [softmax(conv1.weight), softmax(conv2.weight)] with shape (C_out, C_in, 1, 1)
        W = [w1_soft[..., None, None], w2_soft[..., None, None]]
    else:
        assert H_prev is not None
        H_prev = H_prev.astype(jnp.float32)
        hprev_spec = pl.BlockSpec((1, tm, tk), lambda o, i, j, k: (o, i, k))
        cost = pl.CostEstimate(
            flops=2 * C_out * N * N * N + 2 * C_out * C_in * N * N,
            transcendentals=0,
            bytes_accessed=C_in * N * N * 4 + 2 * C_out * N * N * 4)
        H = pl.pallas_call(
            _gt_rest_kernel,
            out_shape=jax.ShapeDtypeStruct((C_out, N, N), jnp.float32),
            grid=grid,
            in_specs=[w_spec, hprev_spec, a_kj_spec],
            out_specs=out_spec,
            scratch_shapes=scratch,
            compiler_params=cparams,
            cost_estimate=cost,
        )(w1_soft, H_prev, A)
        W = [w1_soft[..., None, None]]
    return H, W


# ---------------------------------------------------------------------------
# Pure-JAX reference (mirrors the PyTorch module line by line, full f32)
# ---------------------------------------------------------------------------
def _ref_gtconv(A, weight4d):
    ws = jax.nn.softmax(weight4d[..., 0, 0], axis=1)          # (C_out, C_in)
    return jnp.einsum('oc,cnm->onm', ws, A)                   # sum over in_channels


def _ref_forward(A, w1, w2=None, H_prev=None, first=True):
    if first:
        a = _ref_gtconv(A, w1)
        b = _ref_gtconv(A, w2)
        return jnp.einsum('onk,okm->onm', a, b)
    a = _ref_gtconv(A, w1)
    return jnp.einsum('onk,okm->onm', H_prev, a)


# ---------------------------------------------------------------------------
if __name__ == "__main__":
    key = jax.random.PRNGKey(0)
    k_a, k_w1, k_w2, k_h, k_a2 = jax.random.split(key, 5)

    in_channels = 4    # number of edge types
    out_channels = 2
    N = 16             # number of nodes (small test size; kernel also tiles larger N)

    A = jax.random.uniform(k_a, (in_channels, N, N), dtype=jnp.float32)

    # GTConv.weight has shape (out_channels, in_channels, 1, 1); reset_parameters uses
    # constant 0.1 — perturb so the softmax is non-uniform and the check is non-trivial.
    conv1_w = 0.1 + 0.05 * jax.random.normal(
        k_w1, (out_channels, in_channels, 1, 1), dtype=jnp.float32)
    conv2_w = 0.1 + 0.05 * jax.random.normal(
        k_w2, (out_channels, in_channels, 1, 1), dtype=jnp.float32)

    # ---- first=True path ----
    # NOTE: bf16 matmul operands (f32 accumulate) -> compare with relaxed tolerance.
    H, W = gt_layer_forward(A, conv1_w, conv2_w, first=True)
    H = jax.block_until_ready(H)
    H_ref = _ref_forward(A, conv1_w, conv2_w, first=True)
    np.testing.assert_allclose(np.asarray(H), np.asarray(H_ref), rtol=2e-2, atol=2e-2)
    assert len(W) == 2 and W[0].shape == (out_channels, in_channels, 1, 1)

    # ---- first=False path ----
    H_prev = jax.random.uniform(k_h, (out_channels, N, N), dtype=jnp.float32)
    H2, W2 = gt_layer_forward(A, conv1_w, H_prev=H_prev, first=False)
    H2 = jax.block_until_ready(H2)
    H2_ref = _ref_forward(A, conv1_w, H_prev=H_prev, first=False)
    np.testing.assert_allclose(np.asarray(H2), np.asarray(H2_ref), rtol=2e-2, atol=2e-2)
    assert len(W2) == 1

    # ---- larger N exercising the tiled K-accumulator / multi-tile index maps ----
    N_big = 256
    A_big = jax.random.uniform(k_a2, (in_channels, N_big, N_big), dtype=jnp.float32)
    H3, _ = gt_layer_forward(A_big, conv1_w, conv2_w, first=True,
                             tile_m=128, tile_n=128, tile_k=128)
    H3 = jax.block_until_ready(H3)
    H3_ref = _ref_forward(A_big, conv1_w, conv2_w, first=True)
    np.testing.assert_allclose(np.asarray(H3), np.asarray(H3_ref), rtol=2e-2, atol=2e-2)

    # TODO(synk): for very small N (like the 16-node toy case) the output lanes are
    # mostly masked; real workloads should pad N to a multiple of 128 or skip Pallas.
    print("KERNEL_OK")
</pallas_src>

<mosaic_0001>
module attributes {stable_mosaic.version = 11 : i64} {
  func.func @_gt_first_kernel(%arg0: i32, %arg1: i32, %arg2: i32, %arg3: i32, %arg4: memref<2x4xf32, #tpu.memory_space<smem>>, %arg5: memref<2x4xf32, #tpu.memory_space<smem>>, %arg6: memref<4x16x16xf32, #tpu.memory_space<vmem>>, %arg7: memref<4x16x16xf32, #tpu.memory_space<vmem>>, %arg8: memref<1x16x16xf32, #tpu.memory_space<vmem>>, %arg9: memref<16x16xf32, #tpu.memory_space<vmem>>) attributes {dimension_semantics = [#tpu.dimension_semantics<parallel>, #tpu.dimension_semantics<parallel>, #tpu.dimension_semantics<parallel>, #tpu.dimension_semantics<arbitrary>], iteration_bounds = array<i64: 2, 1, 1, 1>, scalar_prefetch = 0 : i64, scratch_operands = 1 : i64, tpu.core_type = #tpu.core_type<tc>, window_params = [{transform_indices = @transform_0, window_bounds = array<i64: 2, 4>}, {transform_indices = @transform_1, window_bounds = array<i64: 2, 4>}, {transform_indices = @transform_2, window_bounds = array<i64: 4, 16, 16>}, {transform_indices = @transform_3, window_bounds = array<i64: 4, 16, 16>}, {transform_indices = @transform_4, window_bounds = array<i64: 1, 16, 16>}]} {
    %c0_i32 = arith.constant 0 : i32
    %0 = arith.cmpi eq, %arg3, %c0_i32 : i32
    %1 = arith.extui %0 : i1 to i32
    %c0_i32_0 = arith.constant 0 : i32
    %2 = arith.cmpi ne, %1, %c0_i32_0 : i32
    scf.if %2 {
      %cst_35 = arith.constant 0.000000e+00 : f32
      %66 = vector.broadcast %cst_35 : f32 to vector<16x16xf32>
      %c0_36 = arith.constant 0 : index
      %c0_37 = arith.constant 0 : index
      %67 = vector.load %arg9[%c0_36, %c0_37] : memref<16x16xf32, #tpu.memory_space<vmem>>, vector<16x16xf32>
      tpu.vector_store %arg9[%c0_36, %c0_37], %66 {strides = array<i32>} : memref<16x16xf32, #tpu.memory_space<vmem>>, vector<16x16xf32>,
    } else {
    }
    %3 = arith.index_cast %arg0 : i32 to index
    %c0 = arith.constant 0 : index
    %4 = memref.load %arg4[%3, %c0] : memref<2x4xf32, #tpu.memory_space<smem>>
    %c0_1 = arith.constant 0 : index
    %c0_2 = arith.constant 0 : index
    %c0_3 = arith.constant 0 : index
    %5 = vector.load %arg6[%c0_1, %c0_2, %c0_3] : memref<4x16x16xf32, #tpu.memory_space<vmem>>, vector<1x16x16xf32>
    %6 = vector.shape_cast %5 : vector<1x16x16xf32> to vector<16x16xf32>
    %7 = vector.broadcast %4 : f32 to vector<16x16xf32>
    %8 = arith.mulf %7, %6 : vector<16x16xf32>
    %9 = arith.index_cast %arg0 : i32 to index
    %c0_4 = arith.constant 0 : index
    %10 = memref.load %arg5[%9, %c0_4] : memref<2x4xf32, #tpu.memory_space<smem>>
    %c0_5 = arith.constant 0 : index
    %c0_6 = arith.constant 0 : index
    %c0_7 = arith.constant 0 : index
    %11 = vector.load %arg7[%c0_5, %c0_6, %c0_7] : memref<4x16x16xf32, #tpu.memory_space<vmem>>, vector<1x16x16xf32>
    %12 = vector.shape_cast %11 : vector<1x16x16xf32> to vector<16x16xf32>
    %13 = vector.broadcast %10 : f32 to vector<16x16xf32>
    %14 = arith.mulf %13, %12 : vector<16x16xf32>
    %15 = arith.index_cast %arg0 : i32 to index
    %c1 = arith.constant 1 : index
    %16 = memref.load %arg4[%15, %c1] : memref<2x4xf32, #tpu.memory_space<smem>>
    %c1_8 = arith.constant 1 : index
    %c0_9 = arith.constant 0 : index
    %c0_10 = arith.constant 0 : index
    %17 = vector.load %arg6[%c1_8, %c0_9, %c0_10] : memref<4x16x16xf32, #tpu.memory_space<vmem>>, vector<1x16x16xf32>
    %18 = vector.shape_cast %17 : vector<1x16x16xf32> to vector<16x16xf32>
    %19 = vector.broadcast %16 : f32 to vector<16x16xf32>
    %20 = arith.mulf %19, %18 : vector<16x16xf32>
    %21 = arith.addf %8, %20 : vector<16x16xf32>
    %22 = arith.index_cast %arg0 : i32 to index
    %c1_11 = arith.constant 1 : index
    %23 = memref.load %arg5[%22, %c1_11] : memref<2x4xf32, #tpu.memory_space<smem>>
    %c1_12 = arith.constant 1 : index
    %c0_13 = arith.constant 0 : index
    %c0_14 = arith.constant 0 : index
    %24 = vector.load %arg7[%c1_12, %c0_13, %c0_14] : memref<4x16x16xf32, #tpu.memory_space<vmem>>, vector<1x16x16xf32>
    %25 = vector.shape_cast %24 : vector<1x16x16xf32> to vector<16x16xf32>
    %26 = vector.broadcast %23 : f32 to vector<16x16xf32>
    %27 = arith.mulf %26, %25 : vector<16x16xf32>
    %28 = arith.addf %14, %27 : vector<16x16xf32>
    %29 = arith.index_cast %arg0 : i32 to index
    %c2 = arith.constant 2 : index
    %30 = memref.load %arg4[%29, %c2] : memref<2x4xf32, #tpu.memory_space<smem>>
    %c2_15 = arith.constant 2 : index
    %c0_16 = arith.constant 0 : index
    %c0_17 = arith.constant 0 : index
    %31 = vector.load %arg6[%c2_15, %c0_16, %c0_17] : memref<4x16x16xf32, #tpu.memory_space<vmem>>, vector<1x16x16xf32>
    %32 = vector.shape_cast %31 : vector<1x16x16xf32> to vector<16x16xf32>
    %33 = vector.broadcast %30 : f32 to vector<16x16xf32>
    %34 = arith.mulf %33, %32 : vector<16x16xf32>
    %35 = arith.addf %21, %34 : vector<16x16xf32>
    %36 = arith.index_cast %arg0 : i32 to index
    %c2_18 = arith.constant 2 : index
    %37 = memref.load %arg5[%36, %c2_18] : memref<2x4xf32, #tpu.memory_space<smem>>
    %c2_19 = arith.constant 2 : index
    %c0_20 = arith.constant 0 : index
    %c0_21 = arith.constant 0 : index
    %38 = vector.load %arg7[%c2_19, %c0_20, %c0_21] : memref<4x16x16xf32, #tpu.memory_space<vmem>>, vector<1x16x16xf32>
    %39 = vector.shape_cast %38 : vector<1x16x16xf32> to vector<16x16xf32>
    %40 = vector.broadcast %37 : f32 to vector<16x16xf32>
    %41 = arith.mulf %40, %39 : vector<16x16xf32>
    %42 = arith.addf %28, %41 : vector<16x16xf32>
    %43 = arith.index_cast %arg0 : i32 to index
    %c3 = arith.constant 3 : index
    %44 = memref.load %arg4[%43, %c3] : memref<2x4xf32, #tpu.memory_space<smem>>
    %c3_22 = arith.constant 3 : index
    %c0_23 = arith.constant 0 : index
    %c0_24 = arith.constant 0 : index
    %45 = vector.load %arg6[%c3_22, %c0_23, %c0_24] : memref<4x16x16xf32, #tpu.memory_space<vmem>>, vector<1x16x16xf32>
    %46 = vector.shape_cast %45 : vector<1x16x16xf32> to vector<16x16xf32>
    %47 = vector.broadcast %44 : f32 to vector<16x16xf32>
    %48 = arith.mulf %47, %46 : vector<16x16xf32>
    %49 = arith.addf %35, %48 : vector<16x16xf32>
    %50 = arith.index_cast %arg0 : i32 to index
    %c3_25 = arith.constant 3 : index
    %51 = memref.load %arg5[%50, %c3_25] : memref<2x4xf32, #tpu.memory_space<smem>>
    %c3_26 = arith.constant 3 : index
    %c0_27 = arith.constant 0 : index
    %c0_28 = arith.constant 0 : index
    %52 = vector.load %arg7[%c3_26, %c0_27, %c0_28] : memref<4x16x16xf32, #tpu.memory_space<vmem>>, vector<1x16x16xf32>
    %53 = vector.shape_cast %52 : vector<1x16x16xf32> to vector<16x16xf32>
    %54 = vector.broadcast %51 : f32 to vector<16x16xf32>
    %55 = arith.mulf %54, %53 : vector<16x16xf32>
    %56 = arith.addf %42, %55 : vector<16x16xf32>
    %c0_29 = arith.constant 0 : index
    %c0_30 = arith.constant 0 : index
    %57 = vector.load %arg9[%c0_29, %c0_30] : memref<16x16xf32, #tpu.memory_space<vmem>>, vector<16x16xf32>
    %58 = arith.truncf %49 : vector<16x16xf32> to vector<16x16xbf16>
    %59 = arith.truncf %56 : vector<16x16xf32> to vector<16x16xbf16>
    %cst = arith.constant dense<0.000000e+00> : vector<16x16xf32>
    %60 = tpu.matmul %58, %59, %cst {dimension_numbers = #tpu.dot_dimension_numbers<[1], [0], [0], [1], [0, 0, 1, 1], [], []>} : vector<16x16xbf16>, vector<16x16xbf16>, vector<16x16xf32> -> vector<16x16xf32>
    %61 = arith.addf %57, %60 : vector<16x16xf32>
    %c0_31 = arith.constant 0 : index
    %c0_32 = arith.constant 0 : index
    %62 = vector.load %arg9[%c0_31, %c0_32] : memref<16x16xf32, #tpu.memory_space<vmem>>, vector<16x16xf32>
    tpu.vector_store %arg9[%c0_31, %c0_32], %61 {strides = array<i32>} : memref<16x16xf32, #tpu.memory_space<vmem>>, vector<16x16xf32>,
    %c0_i32_33 = arith.constant 0 : i32
    %63 = arith.cmpi eq, %arg3, %c0_i32_33 : i32
    %64 = arith.extui %63 : i1 to i32
    %c0_i32_34 = arith.constant 0 : i32
    %65 = arith.cmpi ne, %64, %c0_i32_34 : i32
    scf.if %65 {
      %c0_35 = arith.constant 0 : index
      %c0_36 = arith.constant 0 : index
      %66 = vector.load %arg9[%c0_35, %c0_36] : memref<16x16xf32, #tpu.memory_space<vmem>>, vector<16x16xf32>
      %c0_37 = arith.constant 0 : index
      %c0_38 = arith.constant 0 : index
      %c0_39 = arith.constant 0 : index
      %67 = vector.load %arg8[%c0_37, %c0_38, %c0_39] : memref<1x16x16xf32, #tpu.memory_space<vmem>>, vector<1x16x16xf32>
      %68 = vector.shape_cast %67 : vector<1x16x16xf32> to vector<16x16xf32>
      %69 = vector.shape_cast %66 : vector<16x16xf32> to vector<1x16x16xf32>
      tpu.vector_store %arg8[%c0_37, %c0_38, %c0_39], %69 {strides = array<i32>} : memref<1x16x16xf32, #tpu.memory_space<vmem>>, vector<1x16x16xf32>,
    } else {
    }
    return
  }
  func.func @transform_0(%arg0: i32, %arg1: i32, %arg2: i32, %arg3: i32) -> (i32, i32) {
    %c0_i32 = arith.constant 0 : i32
    %c0_i32_0 = arith.constant 0 : i32
    %c0_i32_1 = arith.constant 0 : i32
    return %c0_i32, %c0_i32_0 : i32, i32
  }
  func.func @transform_1(%arg0: i32, %arg1: i32, %arg2: i32, %arg3: i32) -> (i32, i32) {
    %c0_i32 = arith.constant 0 : i32
    %c0_i32_0 = arith.constant 0 : i32
    %c0_i32_1 = arith.constant 0 : i32
    return %c0_i32, %c0_i32_0 : i32, i32
  }
  func.func @transform_2(%arg0: i32, %arg1: i32, %arg2: i32, %arg3: i32) -> (i32, i32, i32) {
    %c0_i32 = arith.constant 0 : i32
    %c0_i32_0 = arith.constant 0 : i32
    return %c0_i32, %arg1, %arg3 : i32, i32, i32
  }
  func.func @transform_3(%arg0: i32, %arg1: i32, %arg2: i32, %arg3: i32) -> (i32, i32, i32) {
    %c0_i32 = arith.constant 0 : i32
    %c0_i32_0 = arith.constant 0 : i32
    return %c0_i32, %arg3, %arg2 : i32, i32, i32
  }
  func.func @transform_4(%arg0: i32, %arg1: i32, %arg2: i32, %arg3: i32) -> (i32, i32, i32) {
    %c0_i32 = arith.constant 0 : i32
    return %arg0, %arg1, %arg2 : i32, i32, i32
  }
}

</mosaic_0001>

<bundles_post_ra>
// kernel: tpu_custom_call.1
= control target key start
LH: loop header
LB: loop body
LE: loop exit
PB: predicated region body
PF: predicated region fallthrough
CT: control target
= control target key end

     0   :  { %s1053_s0 = inlined_call_operand.hbm [shape: f32[2,4], index: 0, kind: input, shape index: {}]   ;;  %s1054_s1 = inlined_call_operand.hbm [shape: f32[2,4], index: 1, kind: input, shape index: {}]   ;;  %s1055_s2 = inlined_call_operand.hbm [shape: f32[4,16,16], index: 2, kind: input, shape index: {}]   ;;  %s1056_s3 = inlined_call_operand.hbm [shape: f32[4,16,16], index: 3, kind: input, shape index: {}]   ;;  %s1057_s4 = inlined_call_operand.hbm [shape: f32[2,16,16], index: 4, kind: output, shape index: {}]  }
   0x1   :  { %1058 = sst [smem:[#allocation18_spill]] %s1053_s0 }
   0x2   :  { %9 = vsyncpa [#allocation6], 0 }
   0x3   :  { %10 = vsyncpa [#allocation8], 0 }
   0x4   :  { %11 = vsyncpa [#allocation4], 0 }
   0x5   :  { %12 = vsyncpa [#allocation11], 0 }
   0x6   :  { %13 = vsyncpa [#allocation5], 0 }
   0x7   :  { %15 = vsyncpa [#allocation5 + $0x1], 0  ;;  %s884_s15 = smov 0   ;;  %s886_s16 = smov 0  }
   0x8   :  { %s888_s17 = smov 0   ;;  %s890_s18 = smov 0  }
   0x9   :  { %s892_s19 = smov 0   ;;  %s894_s20 = smov 0  }
   0xa LB: > { %s542_s21 = sadd.s32 4294967295, %s848_s20   ;;  %s543_s22 = sadd.s32 4294967294, %s848_s20   ;;  %s848_s20 = sphi %s894_s20, %s21_s20   ;;  %s844_s19 = sphi %s892_s19, %s1069_s19   ;;  %s840_s18 = sphi %s890_s18, %s1068_s18   ;;  %s836_s17 = sphi %s888_s17, %s1067_s17   ;;  %s832_s16 = sphi %s886_s16, %s1066_s16   ;;  %s828_s15 = sphi %s884_s15, %s1065_s15  }
   0xb   : > { %s47_s23 = sadd.s32 1, %s844_s19  ;;  %s156_s24 = sadd.s32 1, %s836_s17 }
   0xc   : > { %p49_p0 = scmp.ge.s32.totalorder %s47_s23, 2  ;;  %p166_p1 = scmp.ne.s32.totalorder %s836_s17, %s832_s16 }
   0xd   : > { %p167_p2 = scmp.eq.s32.totalorder %s542_s21, 1  ;;  %p172_p3 = scmp.ne.s32.totalorder %s832_s16, %s828_s15 }
   0xe   : > { %s1071_s23 = smov (%p49_p0, %s47_s23), 0  ;;  %p173_p5 = scmp.eq.s32.totalorder %s543_s22, 1 }
   0xf   : > { %p924_p4 = por %p167_p2, %p166_p1  ;;  %s149_s26 = ssub.s32 %s844_s19, %s1071_s23 }
  0x10   : > { %p544_p6 = scmp.ge.s32.totalorder %s848_s20, 1  ;;  %p154_p7 = scmp.eq.s32.totalorder %s149_s26, 0 }
  0x11   : > { %p931_p8 = por %p173_p5, %p172_p3  ;;  %p180_p9 = scmp.lt.s32.totalorder %s848_s20, 3 }
  0x12   : > { %s937_s28 = scalar_select %p154_p7, %s836_s17, %s156_s24  }
  0x13   : > { %p939_p10 = pnand %p544_p6, %p180_p9  ;;  %p943_p11 = scmp.eq.s32.totalorder %s542_s21, 0 }
  0x14   : > { %s1063_s0 = sld [smem:[#allocation18_spill]]  ;;  %s202_s10 = sshll.u32 %s1054_s1, 4  ;;  %s203_s10 = int_to_ptr.hbm [resolvable:$true] %s202_s10 }
  0x15   : > { %p581_p12 = pneg %p939_p10  ;;  %s215_s14 = sshll.u32 %s1055_s2, 4  ;;  %s216_s14 = int_to_ptr.hbm [resolvable:$true] %s215_s14 }
  0x16   : > { %s850_s21 = smov [#allocation3]   ;;  %s851_s22 = smov [#allocation7]  }
  0x17   : > { %p957_p13 = pnand %p943_p11, %p581_p12  ;;  %s852_s24 = smov [#allocation9]  }
  0x18   : > { %s217_s26 = sshll.u32 %s852_s24, 4  ;;  %s853_s5 = smov 128   ;;  %s218_s26 = int_to_ptr.vmem [resolvable:$true] %s217_s26 }
  0x19   : > { %587 = dma.hbm_to_smem (!%p957_p13), %s203_s10, 32, %s851_s22, [#allocation8]  }
  0x1a   : > { %s192_s7 = sshll.u32 %s1063_s0, 4  ;;  %s854_s6 = smov 8   ;;  %s193_s7 = int_to_ptr.hbm [resolvable:$true] %s192_s7 }
  0x1b   : > { %584 = dma.hbm_to_smem (!%p957_p13), %s193_s7, 32, %s850_s21, [#allocation6]  }
  0x1c   : > { %590 = dma.hbm_to_vmem [thread:$0]  (!%p957_p13), %s216_s14, 1024, %s218_s26, [#allocation4], %s853_s5, %s853_s5, %s854_s6  }
  0x1d   : > { %s233_s12 = sshll.u32 %s1056_s3, 4  ;;  %s855_s13 = smov [#allocation10]   ;;  %s234_s12 = int_to_ptr.hbm [resolvable:$true] %s233_s12 }
  0x1e   : > { %s235_s0 = sshll.u32 %s855_s13, 4  ;;  %251 = sbr.rel (%p939_p10) target bundleno = 218 (0xda), region = 36  ;;  %s236_s0 = int_to_ptr.vmem [resolvable:$true] %s235_s0 }
  0x1f   : > { %593 = dma.hbm_to_vmem [thread:$0]  (!%p957_p13), %s234_s12, 1024, %s236_s0, [#allocation11], %s853_s5, %s853_s5, %s854_s6  }
  0x23   : > { %807 = dma.done.wait (%p943_p11), [#allocation6], 32  }
  0x24   : > { %809 = vsyncadd (%p943_p11), [#allocation6], 4294967264 }
  0x25   : > { %811 = dma.done.wait (%p943_p11), [#allocation8], 32  }
  0x26   : > { %813 = vsyncadd (%p943_p11), [#allocation8], 4294967264 }
  0x27   : > { %815 = dma.done.wait (%p943_p11), [#allocation4], 1024  }
  0x28   : > { %817 = vsyncadd (%p943_p11), [#allocation4], 4294966272 }
  0x29   : > { %819 = dma.done.wait (%p943_p11), [#allocation11], 1024  }
  0x2a   : > { %821 = vsyncadd (%p943_p11), [#allocation11], 4294966272 }
  0x2b   : > { %273 = sfence }
  0x2c   : > { %s555_s0 = sshll.u32 %s840_s18, 7  ;;  %vm297_vm0 = vcmask 130048   ;;  %v856_v0 = vmov 0.0   ;;  %v308_v1 = vld [vmem:[#allocation10] sm:$0xff]  ;;  %v309_v2 = vld [vmem:[#allocation10 + $0x8] sm:$0xff]  ;;  %v325_v4 = vld [vmem:[#allocation10 + $0x10] sm:$0xff] }
  0x2d   : > { %s307_s29 = sld [smem:[#allocation7 + %s555_s0]]  ;;  %s313_s7 = sadd.s32 1, %s555_s0  ;;  %298 = vst.msk [vmem:[#allocation2] sm:$0xff] %vm297_vm0, %v856_v0  ;;  %v326_v5 = vld [vmem:[#allocation10 + $0x18] sm:$0xff]  ;;  %v344_v9 = vld [vmem:[#allocation10 + $0x20] sm:$0xff]  ;;  %v345_v10 = vld [vmem:[#allocation10 + $0x28] sm:$0xff] }
  0x2e   : > { %s995_s10 = sld [smem:[#allocation3 + %s313_s7]]  ;;  %s332_s11 = sadd.s32 2, %s555_s0  ;;  %299 = vst.msk [vmem:[#allocation2 + $0x8] sm:$0xff] %vm297_vm0, %v856_v0  ;;  %v316_v13 = vld [vmem:[#allocation9 + $0x10] sm:$0xff]  ;;  %v317_v14 = vld [vmem:[#allocation9 + $0x18] sm:$0xff]  ;;  %v335_v24 = vld [vmem:[#allocation9 + $0x20] sm:$0xff] }
  0x2f   : > { %s323_s14 = sld [smem:[#allocation7 + %s313_s7]]  ;;  %s351_s22 = sadd.s32 3, %s555_s0  ;;  %v363_v17 = vld [vmem:[#allocation10 + $0x30] sm:$0xff]  ;;  %v364_v18 = vld [vmem:[#allocation10 + $0x38] sm:$0xff]  ;;  %v336_v25 = vld [vmem:[#allocation9 + $0x28] sm:$0xff] }
  0x30   : > { %s998_s21 = sld [smem:[#allocation3 + %s332_s11]]  ;;  %v302_v27 = vld [vmem:[#allocation9] sm:$0xff]  ;;  %v303_v28 = vld [vmem:[#allocation9 + $0x8] sm:$0xff]  ;;  %v354_v36 = vld [vmem:[#allocation9 + $0x30] sm:$0xff]  ;;  %s286_s6 = sand.u32 1, %s832_s16  }
  0x31   : > { %s342_s30 = sld [smem:[#allocation7 + %s332_s11]]  ;;  %v355_v40 = vld [vmem:[#allocation9 + $0x38] sm:$0xff]  ;;  %s554_s8 = sshll.u32 %s286_s6, 4 }
  0x32   : > { %s1000_s24 = sld [smem:[#allocation3 + %s351_s22]]  ;;  %s562_s9 = sshll.u32 %s840_s18, 4 }
  0x33   : > { %v310_v3 = vstv %s307_s29  ;;  %s1002_s26 = sld [smem:[#allocation7 + %s351_s22]]  ;;  %s288_s29 = scalar_lea.vmem [#allocation12], %s554_s8 }
  0x34   : > { %v311_v6 = vmul.f32 %v310_v3, %v308_v1  ;;  %v312_v7 = vmul.f32 %v310_v3, %v309_v2  ;;  %s1004_s5 = sld [smem:[#allocation3 + %s555_s0]]  ;;  %v318_v15 = vstv %s995_s10  ;;  %v370_v55 = vld [vmem:[#allocation2] sm:$0xff]  ;;  %s418_s0 = scalar_lea.hbm %s1057_s4, %s562_s9 }
  0x35   : > { %v327_v8 = vstv %s323_s14  ;;  %v319_v29 = vmul.f32 %v318_v15, %v316_v13  ;;  %v320_v30 = vmul.f32 %v318_v15, %v317_v14  ;;  %v371_v58 = vld [vmem:[#allocation2 + $0x8] sm:$0xff]  ;;  %s419_s7 = sshll.u32 %s288_s29, 4  ;;  %s421_s10 = sshll.u32 %s418_s0, 4  ;;  %s420_s7 = int_to_ptr.vmem [resolvable:$true] %s419_s7  ;;  %s422_s10 = int_to_ptr.hbm [resolvable:$true] %s421_s10 }
  0x36   : > { %v328_v11 = vmul.f32 %v327_v8, %v325_v4  ;;  %v329_v12 = vmul.f32 %v327_v8, %v326_v5  ;;  %v337_v19 = vstv %s998_s21  ;;  %s404_s18 = scalar_lea.sflag [#allocation5], %s286_s6  ;;  %s768_s11 = sshra.s32 %s422_s10, 4  ;;  %s769_s11 = int_to_ptr.hbm [resolvable:$true] %s768_s11 }
  0x37   : > { %v346_v16 = vstv %s342_s30  ;;  %v338_v38 = vmul.f32 %v337_v19, %v335_v24  ;;  %v339_v39 = vmul.f32 %v337_v19, %v336_v25  ;;  %s770_s14 = scalar_lea.hbm %s769_s11, 16  ;;  %s774_s30 = scalar_lea.hbm %s1057_s4, 32 }
  0x38   : > { %v330_v20 = vadd.f32 %v328_v11, %v311_v6  ;;  %v331_v21 = vadd.f32 %v329_v12, %v312_v7  ;;  %v347_v22 = vmul.f32 %v346_v16, %v344_v9  ;;  %v348_v23 = vmul.f32 %v346_v16, %v345_v10  ;;  %p771_p0 = scmp.ne.s32.totalorder %s769_s11, %s770_s14  ;;  %p775_p3 = scmp.lt.s32.totalorder %s769_s11, %s1057_s4 }
  0x39   : > { %v365_v26 = vstv %s1002_s26  ;;  %v356_v31 = vstv %s1000_s24  ;;  %p776_p5 = scmp.lt.s32.totalorder %s774_s30, %s770_s14 }
  0x3a   : > { %v349_v32 = vadd.f32 %v347_v22, %v330_v20  ;;  %v350_v33 = vadd.f32 %v348_v23, %v331_v21  ;;  %v366_v34 = vmul.f32 %v365_v26, %v363_v17  ;;  %v367_v35 = vmul.f32 %v365_v26, %v364_v18  ;;  %p772_p1 = pnand %p771_p0, %p924_p4 }
  0x3b   : > { %v304_v37 = vstv %s1004_s5  ;;  %v357_v45 = vmul.f32 %v356_v31, %v354_v36  ;;  %v358_v49 = vmul.f32 %v356_v31, %v355_v40  ;;  %p777_p6 = por %p776_p5, %p775_p3 }
  0x3c   : > { %v368_v41 = vadd.f32 %v366_v34, %v349_v32  ;;  %v369_v42 = vadd.f32 %v367_v35, %v350_v33  ;;  %v305_v43 = vmul.f32 %v304_v37, %v302_v27  ;;  %v306_v44 = vmul.f32 %v304_v37, %v303_v28  ;;  %p773_p2 = pneg %p772_p1 }
  0x3e   : > { %v373_v46 = vpack.c.bf16 %v369_v42, %v368_v41  ;;  %v321_v47 = vadd.f32 %v319_v29, %v305_v43  ;;  %v322_v48 = vadd.f32 %v320_v30, %v306_v44  ;;  %p778_p7 = pnand %p777_p6, %p773_p2 }
  0x40   : > { %385 = vmatpush.bf16.msra.mxu0 %v373_v46  ;;  %v340_v50 = vadd.f32 %v338_v38, %v321_v47  ;;  %v341_v51 = vadd.f32 %v339_v39, %v322_v48 }
  0x42   : > { %v359_v52 = vadd.f32 %v357_v45, %v340_v50  ;;  %v360_v53 = vadd.f32 %v358_v49, %v341_v51 }
  0x44   : > { %v372_v54 = vpack.c.bf16 %v360_v53, %v359_v52 }
  0x46   : > { %556 = vmatmul.msk.bf16.vlgmr.msra.gmra.mxu0 %vm297_vm0, %v372_v54 }
  0xc3   : > { %v387_v56 = vpop.f32.mrf.mxu0 }
  0xc4   : > { %v392_v57 = vadd.f32 %v387_v56, %v370_v55 }
  0xc6   : > { %394 = vst.msk [vmem:[#allocation2] sm:$0xff] %vm297_vm0, %v392_v57 }
  0xcb   : > { %v389_v59 = vpop.f32.mrf.mxu0 }
  0xcc   : > { %v393_v60 = vadd.f32 %v389_v59, %v371_v58 }
  0xcd   : > { %v399_v61 = vld [vmem:[#allocation2] sm:$0xff] }
  0xce   : > { %395 = vst.msk [vmem:[#allocation2 + $0x8] sm:$0xff] %vm297_vm0, %v393_v60 }
  0xcf   : > { %401 = vst.msk [vmem:[%s288_s29] sm:$0xff] %vm297_vm0, %v399_v61 }
  0xd5   : > { %v400_v62 = vld [vmem:[#allocation2 + $0x8] sm:$0xff] }
  0xd6   : > { %402 = vst.msk [vmem:[%s288_s29 + $0x8] sm:$0xff] %vm297_vm0, %v400_v62 }
  0xd7   : > { %781 = shalt.err (!%p778_p7)
}
  0xd8   : > { %s857_s5 = smov 128   ;;  %s858_s6 = smov 8  }
  0xd9   : > { %579 = dma.vmem_to_hbm [thread:$0]  (%p924_p4), %s420_s7, 256, %s422_s10, %s404_s18, %s857_s5, %s857_s5, %s858_s6  }
  0xda PF: > { %p606_p9 = scmp.ge.s32.totalorder %s848_s20, 2  ;;  %s436_s8 = sand.u32 1, %s828_s15  }
  0xdb   : > { %s437_s9 = scalar_lea.sflag [#allocation5], %s436_s8 }
  0xdc   : > { %p595_p10 = pnand %p606_p9, %p931_p8 }
  0xde   : > { %p596_p11 = pneg %p595_p10 }
  0xe0   : > { %823 = dma.done.wait (%p596_p11), %s437_s9, 256  }
  0xe1   : > { %825 = vsyncadd (%p596_p11), %s437_s9, 4294967040  ;;  %s21_s20 = sadd.s32 1, %s848_s20   ;;  %s1065_s15 = smov %s832_s16 }
  0xe2   : > { %p18_p12 = scmp.ge.s32.totalorder %s21_s20, 4   ;;  %s1066_s16 = smov %s836_s17 }
  0xe3   : > { %s1067_s17 = smov %s937_s28  ;;  %s1068_s18 = smov %s844_s19 }
  0xe4   : > { %s1069_s19 = smov %s1071_s23  ;;  %20 = sbr.rel (!%p18_p12) target bundleno = 10 (0xa), region = 102 }
  0xe9   :  { %443 = vsyncpa [#allocation4], 1 }
  0xea   :  { %445 = vsyncpa [#allocation4 + $0x1], 1 }
  0xeb   :  { %446 = vsyncpa [#allocation11], 1 }
  0xec   :  { %447 = vsyncpa [#allocation5], 1 }
  0xed   :  { %449 = vsyncpa [#allocation5 + $0x1], 1 }
  0xee   :  { %450 = vsyncpa [#allocation6], 1 }
  0xef   :  { %452 = vsyncpa [#allocation6 + $0x1], 1 }
  0xf0   :  { %453 = vsyncpa [#allocation8], 1 }

</bundles_post_ra>
